<compile_context>
chip_gen: v5e
topology: v5e:2x2
jax: 0.10.0
libtpu: 0.0.40
codegen_flags: <defaults>
</compile_context>

<pallas_src>
import functools

import jax
import jax.numpy as jnp
from jax.experimental import pallas as pl
from jax.experimental.pallas import tpu as pltpu
import numpy as np

_MIB = 1024 * 1024


# ----------------------------------------------------------------------------
# Generation-aware sizing helpers
# ----------------------------------------------------------------------------
def _vmem_capacity_bytes():
  try:
    cap = int(pltpu.get_tpu_info().vmem_capacity_bytes)
    if cap > 0:
      return cap
  except Exception:
    pass
  return 64 * _MIB  # conservative fallback: fits every generation (incl. v7x)


def _default_exp_in_compute_dtype(cd):
  """bf16 exp is a win on v6e/v7x (bf16 EUP); keep exp in f32 on v5e."""
  if jnp.dtype(cd) != jnp.dtype(jnp.bfloat16):
    return False
  try:
    info = pltpu.get_tpu_info()
    name = "{}{}".format(getattr(info, "chip_version", ""),
                         getattr(info, "chip_name", ""))
    if "5" in str(name):   # v5e: no bf16 EUP/VPU
      return False
  except Exception:
    pass
  return True


def _divisor_blocks(total, step):
  """Divisors of `total` that are multiples of `step`, plus `total`, descending."""
  cands = {total}
  for c in range(step, total, step):
    if total % c == 0:
      cands.add(c)
  return sorted(cands, reverse=True)


def _score_bytes(H, T, Tq, ci, exp_in_cd):
  # f32 scores + probabilities (bf16 if exp is computed in the compute dtype).
  return H * Tq * T * (4 + (ci if exp_in_cd else 4))


def _proj_vmem_bytes(t_blk, E, ci):
  x_blk = 2 * t_blk * E * ci                      # double-buffered x block
  w = 3 * E * E * ci + 3 * E * 4                  # untiled weights + bias
  outs = 2 * 3 * t_blk * E * ci                   # q / k^T / v output blocks
  tmp = t_blk * 3 * E * 4 + 4 * t_blk * E * 4     # f32 qkv + relayout temps
  return x_blk + w + outs + tmp


def _attn_vmem_bytes(H, T, D, E, Tq, ci, co, exp_in_cd):
  q_b = 2 * H * Tq * D * ci                       # q tile (double-buffered)
  kv_b = 2 * 2 * H * T * D * ci                   # k^T + v (double-buffered)
  out_b = 2 * Tq * E * co                         # output tile
  w = H * D * E * ci + E * 4                      # untiled Wo + bo
  s_p = _score_bytes(H, T, Tq, ci, exp_in_cd)     # scores + probs
  misc = H * Tq * D * (4 + ci) + 2 * H * Tq * 4 + 2 * Tq * E * 4
  return q_b + kv_b + out_b + w + s_p + misc


def _pick_q_block(T, H, D, E, ci, co, exp_in_cd, vmem_cap):
  sub = 16 if ci == 2 else 8
  cands = _divisor_blocks(T, sub)
  for c in cands:
    if (_score_bytes(H, T, c, ci, exp_in_cd) <= 0.30 * vmem_cap and
        _attn_vmem_bytes(H, T, D, E, c, ci, co, exp_in_cd) <= 0.75 * vmem_cap):
      return c
  return cands[-1]   # best effort (see TODO about a flash-style KV axis)


def _pick_t_block(T, E, ci, vmem_cap):
  # K output is stored (B,H,D,T): the lane (last) block dim is Tt, so Tt must
  # be a multiple of 128 or the full sequence length.
  sub = 16 if ci == 2 else 8
  cands = [c for c in _divisor_blocks(T, sub) if c % 128 == 0 or c == T]
  capped = [c for c in cands if c <= 512] or cands
  for c in capped:
    if _proj_vmem_bytes(c, E, ci) <= 0.70 * vmem_cap:
      return c
  return capped[-1]


# ----------------------------------------------------------------------------
# Kernels
# ----------------------------------------------------------------------------
def _qkv_projection_kernel(x_ref, wqkv_ref, bqkv_ref, q_ref, kt_ref, v_ref, *,
                           num_heads, head_dim, embed_dim, t_block):
  """Grid (B, T//Tt). x block (1,Tt,E); out q/v (1,H,Tt,D), k^T (1,H,D,Tt)."""
  H, D, E, Tt = num_heads, head_dim, embed_dim, t_block
  cd = q_ref.dtype

  x = x_ref[0]                                                   # (Tt, E)
  qkv = jnp.dot(x, wqkv_ref[...], preferred_element_type=jnp.float32)
  qkv = qkv + bqkv_ref[...]                                      # (Tt, 3E) f32

  def heads(t):                                                  # (Tt,E)->(H,Tt,D)
    return jnp.transpose(t.reshape(Tt, H, D), (1, 0, 2))

  # 1/sqrt(D) is already folded into the Q columns of wqkv / bqkv (wrapper).
  q_ref[0] = heads(qkv[:, 0 * E:1 * E]).astype(cd)
  v_ref[0] = heads(qkv[:, 2 * E:3 * E]).astype(cd)
  k_heads = heads(qkv[:, 1 * E:2 * E])                           # (H, Tt, D) f32
  kt_ref[0] = jnp.transpose(k_heads, (0, 2, 1)).astype(cd)       # (H, D, Tt)


def _attention_kernel(q_ref, kt_ref, v_ref, wo_ref, bo_ref, o_ref, *,
                      num_heads, exp_in_compute_dtype, approx_reciprocal):
  """Grid (B, T//Tq), both axes parallel.

  q_ref (1,H,Tq,D), kt_ref (1,H,D,T), v_ref (1,H,T,D), wo_ref (H,D,E),
  bo_ref (1,E), o_ref (1,Tq,E).
  """
  H = num_heads
  cd = q_ref.dtype

  q = q_ref[0]                                                   # (H, Tq, D)
  kt = kt_ref[0]                                                 # (H, D, T)
  v = v_ref[0]                                                   # (H, T, D)

  # Scores (SDPA scale pre-folded into q at projection time).
  s = jnp.einsum("htd,hds->hts", q, kt,
                 preferred_element_type=jnp.float32)             # (H, Tq, T)

  # Numerically-stable softmax; normalization deferred until after PV.
  m = jnp.max(s, axis=-1, keepdims=True)
  if exp_in_compute_dtype:
    p = jnp.exp((s - m).astype(cd))                              # bf16 EUP path
    l = jnp.sum(p.astype(jnp.float32), axis=-1, keepdims=True)
  else:
    p32 = jnp.exp(s - m)
    l = jnp.sum(p32, axis=-1, keepdims=True)
    p = p32.astype(cd)

  o = jnp.einsum("hts,hsd->htd", p, v,
                 preferred_element_type=jnp.float32)             # (H, Tq, D) f32
  o = (o * pl.reciprocal(l, approx=approx_reciprocal)).astype(cd)

  # Output projection with the head-concat folded into Wo (no (H,Tq,D)->(Tq,E)
  # transpose): out = sum_h o[h] @ Wo^T[h*D:(h+1)*D, :] + bo, f32 accumulate.
  acc = jnp.dot(o[0], wo_ref[0], preferred_element_type=jnp.float32)
  for h in range(1, H):
    acc = acc + jnp.dot(o[h], wo_ref[h], preferred_element_type=jnp.float32)
  o_ref[0] = (acc + bo_ref[...]).astype(o_ref.dtype)


# ----------------------------------------------------------------------------
# Wrapper
# ----------------------------------------------------------------------------
def wav2vec2_sdpa_attention(hidden_states, params, *, num_heads,
                            compute_dtype=jnp.bfloat16, q_block=None,
                            t_block=None, exp_in_compute_dtype=None):
  """hidden_states: (B, T, E).  params: dict of (E,E) weights and (E,) biases.

  Equivalent to Wav2Vec2SdpaAttention.forward with attention_mask=None,
  rotary_pos_embed=False, eval mode (dropout inactive).
  """
  # TODO(synk): rotary_pos_embed path and additive attention_mask not implemented.
  B, T, E = hidden_states.shape
  H = num_heads
  D = E // H
  assert D * H == E, "embed_dim must be divisible by num_heads"

  cd = jnp.dtype(compute_dtype)
  ci = cd.itemsize
  out_dtype = hidden_states.dtype
  co = jnp.dtype(out_dtype).itemsize
  vmem_cap = _vmem_capacity_bytes()

  if exp_in_compute_dtype is None:
    exp_in_compute_dtype = _default_exp_in_compute_dtype(cd)
  approx_recip = cd != jnp.dtype(jnp.float32)      # exact reciprocal on f32 path

  Tq = q_block if q_block is not None else _pick_q_block(
      T, H, D, E, ci, co, exp_in_compute_dtype, vmem_cap)
  assert T % Tq == 0, "seq_len must be divisible by the query block size"
  Tt = t_block if t_block is not None else _pick_t_block(T, E, ci, vmem_cap)
  assert T % Tt == 0, "seq_len must be divisible by the projection time block"

  # ---- glue (XLA): fused / pre-transposed weights, SDPA scale folded into Q --
  scale = D ** -0.5
  wqkv = jnp.concatenate(
      [params["wq"].T * scale, params["wk"].T, params["wv"].T],
      axis=1).astype(cd)                                          # (E, 3E)
  bqkv = jnp.concatenate(
      [params["bq"] * scale, params["bk"], params["bv"]]).reshape(1, 3 * E)
  bqkv = bqkv.astype(jnp.float32)
  wo_r = params["wo"].T.reshape(H, D, E).astype(cd)               # head-major rows
  bo = params["bo"].reshape(1, E).astype(jnp.float32)
  x = hidden_states.astype(cd)

  # ---- kernel 1: fused QKV projection ---------------------------------------
  proj_vmem = _proj_vmem_bytes(Tt, E, ci)
  proj_limit = int(min(vmem_cap, max(32 * _MIB, int(1.25 * proj_vmem))))
  proj_cost = pl.CostEstimate(
      flops=int(2 * B * T * E * 3 * E), transcendentals=0,
      bytes_accessed=int(4 * B * T * E * ci + 3 * E * E * ci + 3 * E * 4))

  q, kt, v = pl.pallas_call(
      functools.partial(_qkv_projection_kernel, num_heads=H, head_dim=D,
                        embed_dim=E, t_block=Tt),
      out_shape=(jax.ShapeDtypeStruct((B, H, T, D), cd),
                 jax.ShapeDtypeStruct((B, H, D, T), cd),
                 jax.ShapeDtypeStruct((B, H, T, D), cd)),
      grid_spec=pltpu.PrefetchScalarGridSpec(
          num_scalar_prefetch=0,
          grid=(B, T // Tt),
          in_specs=[
              pl.BlockSpec((1, Tt, E), lambda b, t: (b, t, 0)),          # x
              pl.BlockSpec(memory_space=pltpu.MemorySpace.VMEM),         # Wqkv
              pl.BlockSpec(memory_space=pltpu.MemorySpace.VMEM),         # bqkv
          ],
          out_specs=(
              pl.BlockSpec((1, H, Tt, D), lambda b, t: (b, 0, t, 0)),    # q
              pl.BlockSpec((1, H, D, Tt), lambda b, t: (b, 0, 0, t)),    # k^T
              pl.BlockSpec((1, H, Tt, D), lambda b, t: (b, 0, t, 0)),    # v
          )),
      compiler_params=pltpu.CompilerParams(
          dimension_semantics=("parallel", "parallel"),
          vmem_limit_bytes=proj_limit),
      cost_estimate=proj_cost,
  )(x, wqkv, bqkv)

  # ---- kernel 2: head-batched attention + output projection ------------------
  attn_vmem = _attn_vmem_bytes(H, T, D, E, Tq, ci, co, exp_in_compute_dtype)
  attn_limit = int(min(vmem_cap, max(32 * _MIB, int(1.25 * attn_vmem))))
  attn_cost = pl.CostEstimate(
      flops=int(4 * B * T * T * E + 2 * B * T * E * E),
      transcendentals=int(B * H * T * T),
      bytes_accessed=int(3 * B * T * E * ci + H * D * E * ci + E * 4
                         + B * T * E * co))

  out = pl.pallas_call(
      functools.partial(_attention_kernel, num_heads=H,
                        exp_in_compute_dtype=exp_in_compute_dtype,
                        approx_reciprocal=approx_recip),
      out_shape=jax.ShapeDtypeStruct((B, T, E), out_dtype),
      grid_spec=pltpu.PrefetchScalarGridSpec(
          num_scalar_prefetch=0,
          grid=(B, T // Tq),
          in_specs=[
              pl.BlockSpec((1, H, Tq, D), lambda b, t: (b, 0, t, 0)),    # q tile
              pl.BlockSpec((1, H, D, T), lambda b, t: (b, 0, 0, 0)),     # k^T full
              pl.BlockSpec((1, H, T, D), lambda b, t: (b, 0, 0, 0)),     # v full
              pl.BlockSpec(memory_space=pltpu.MemorySpace.VMEM),         # Wo (H,D,E)
              pl.BlockSpec(memory_space=pltpu.MemorySpace.VMEM),         # bo
          ],
          out_specs=pl.BlockSpec((1, Tq, E), lambda b, t: (b, t, 0))),
      compiler_params=pltpu.CompilerParams(
          dimension_semantics=("parallel", "parallel"),
          vmem_limit_bytes=attn_limit),
      cost_estimate=attn_cost,
  )(q, kt, v, wo_r, bo)
  return out


# ----------------------------------------------------------------------------
# Reference & test harness
# ----------------------------------------------------------------------------
def _reference(hidden_states, params, *, num_heads):
  """Pure-JAX reference reproducing the PyTorch forward (no mask, eval mode)."""
  B, T, E = hidden_states.shape
  D = E // num_heads

  def lin(x, w, b):
    return x @ w.T + b

  q = lin(hidden_states, params["wq"], params["bq"])
  k = lin(hidden_states, params["wk"], params["bk"])
  v = lin(hidden_states, params["wv"], params["bv"])

  def shape(t):
    return t.reshape(B, T, num_heads, D).transpose(0, 2, 1, 3)   # (B,H,T,D)

  q, k, v = shape(q), shape(k), shape(v)
  s = jnp.einsum("bhtd,bhsd->bhts", q, k) * (D ** -0.5)
  p = jax.nn.softmax(s, axis=-1)
  o = jnp.einsum("bhts,bhsd->bhtd", p, v)
  o = o.transpose(0, 2, 1, 3).reshape(B, T, E)
  return lin(o, params["wo"], params["bo"])


def _make_inputs(key, B, T, E):
  keys = jax.random.split(key, 9)
  scale = 0.02
  params = {
      "wq": scale * jax.random.normal(keys[0], (E, E), jnp.float32),
      "wk": scale * jax.random.normal(keys[1], (E, E), jnp.float32),
      "wv": scale * jax.random.normal(keys[2], (E, E), jnp.float32),
      "wo": scale * jax.random.normal(keys[3], (E, E), jnp.float32),
      "bq": scale * jax.random.normal(keys[4], (E,), jnp.float32),
      "bk": scale * jax.random.normal(keys[5], (E,), jnp.float32),
      "bv": scale * jax.random.normal(keys[6], (E,), jnp.float32),
      "bo": scale * jax.random.normal(keys[7], (E,), jnp.float32),
  }
  hidden_states = jax.random.normal(keys[8], (B, T, E), jnp.float32)
  return params, hidden_states


if __name__ == "__main__":
  key = jax.random.PRNGKey(0)
  k1, k2 = jax.random.split(key)

  # Config 1: single query tile (B=2, T=8, E=32, H=4).
  # Config 2: two query tiles (Tq=16, multiple of 16 so bf16 blocks are legal),
  #           exercises the tiled q axis with full-T K^T / V blocks.
  configs = [
      dict(key=k1, B=2, T=8, E=32, H=4, q_block=None),
      dict(key=k2, B=2, T=32, E=32, H=4, q_block=16),
  ]

  for cfg in configs:
    params, hidden_states = _make_inputs(cfg["key"], cfg["B"], cfg["T"], cfg["E"])
    ref = _reference(hidden_states, params, num_heads=cfg["H"])

    # Exact path (f32 operands, exact reciprocal, f32 exp).
    out_f32 = wav2vec2_sdpa_attention(
        hidden_states, params, num_heads=cfg["H"],
        compute_dtype=jnp.float32, q_block=cfg["q_block"])
    out_f32 = jax.block_until_ready(out_f32)
    assert out_f32.shape == hidden_states.shape
    np.testing.assert_allclose(np.asarray(out_f32), np.asarray(ref),
                               rtol=2e-3, atol=1e-4)

    # Fast path (bf16 MXU operands, f32 accumulation) — perf-recommended config.
    out_bf16 = wav2vec2_sdpa_attention(
        hidden_states, params, num_heads=cfg["H"],
        compute_dtype=jnp.bfloat16, q_block=cfg["q_block"])
    out_bf16 = jax.block_until_ready(out_bf16)
    assert out_bf16.shape == hidden_states.shape
    np.testing.assert_allclose(np.asarray(out_bf16), np.asarray(ref),
                               rtol=3e-2, atol=2e-3)

  print("KERNEL_OK")
</pallas_src>

<mosaic_0001>
module attributes {stable_mosaic.version = 11 : i64} {
  func.func @_qkv_projection_kernel(%arg0: i32, %arg1: i32, %arg2: memref<1x8x32xf32, #tpu.memory_space<vmem>>, %arg3: memref<32x96xf32, #tpu.memory_space<vmem>>, %arg4: memref<1x96xf32, #tpu.memory_space<vmem>>, %arg5: memref<1x4x8x8xf32, #tpu.memory_space<vmem>>, %arg6: memref<1x4x8x8xf32, #tpu.memory_space<vmem>>, %arg7: memref<1x4x8x8xf32, #tpu.memory_space<vmem>>) attributes {dimension_semantics = [#tpu.dimension_semantics<parallel>, #tpu.dimension_semantics<parallel>], iteration_bounds = array<i64: 2, 1>, scalar_prefetch = 0 : i64, scratch_operands = 0 : i64, tpu.core_type = #tpu.core_type<tc>, window_params = [{transform_indices = @transform_0, window_bounds = array<i64: 1, 8, 32>}, {pipeline_mode = #tpu.pipeline_mode<synchronous>, transform_indices = @transform_1, window_bounds = array<i64: 32, 96>}, {pipeline_mode = #tpu.pipeline_mode<synchronous>, transform_indices = @transform_2, window_bounds = array<i64: 1, 96>}, {transform_indices = @transform_3, window_bounds = array<i64: 1, 4, 8, 8>}, {transform_indices = @transform_4, window_bounds = array<i64: 1, 4, 8, 8>}, {transform_indices = @transform_5, window_bounds = array<i64: 1, 4, 8, 8>}]} {
    %c0 = arith.constant 0 : index
    %c0_0 = arith.constant 0 : index
    %c0_1 = arith.constant 0 : index
    %0 = vector.load %arg2[%c0, %c0_0, %c0_1] : memref<1x8x32xf32, #tpu.memory_space<vmem>>, vector<1x8x32xf32>
    %1 = vector.shape_cast %0 : vector<1x8x32xf32> to vector<8x32xf32>
    %c0_2 = arith.constant 0 : index
    %c0_3 = arith.constant 0 : index
    %2 = vector.load %arg3[%c0_2, %c0_3] : memref<32x96xf32, #tpu.memory_space<vmem>>, vector<32x96xf32>
    %cst = arith.constant dense<0.000000e+00> : vector<8x96xf32>
    %3 = tpu.matmul %1, %2, %cst {dimension_numbers = #tpu.dot_dimension_numbers<[1], [0], [0], [1], [0, 0, 1, 1], [], []>} : vector<8x32xf32>, vector<32x96xf32>, vector<8x96xf32> -> vector<8x96xf32>
    %c0_4 = arith.constant 0 : index
    %c0_5 = arith.constant 0 : index
    %4 = vector.load %arg4[%c0_4, %c0_5] : memref<1x96xf32, #tpu.memory_space<vmem>>, vector<1x96xf32>
    %5 = vector.broadcast %4 : vector<1x96xf32> to vector<8x96xf32>
    %6 = arith.addf %3, %5 : vector<8x96xf32>
    %7 = vector.extract_strided_slice %6 {offsets = [0, 0], sizes = [8, 32], strides = [1, 1]} : vector<8x96xf32> to vector<8x32xf32>
    %8 = vector.shape_cast %7 : vector<8x32xf32> to vector<8x4x8xf32>
    %9 = tpu.transpose %8, [1, 0, 2] : vector<8x4x8xf32> -> vector<4x8x8xf32>
    %c0_6 = arith.constant 0 : index
    %c0_7 = arith.constant 0 : index
    %c0_8 = arith.constant 0 : index
    %c0_9 = arith.constant 0 : index
    %10 = vector.load %arg5[%c0_6, %c0_7, %c0_8, %c0_9] : memref<1x4x8x8xf32, #tpu.memory_space<vmem>>, vector<1x4x8x8xf32>
    %11 = vector.shape_cast %10 : vector<1x4x8x8xf32> to vector<4x8x8xf32>
    %12 = vector.shape_cast %9 : vector<4x8x8xf32> to vector<1x4x8x8xf32>
    tpu.vector_store %arg5[%c0_6, %c0_7, %c0_8, %c0_9], %12 {strides = array<i32>} : memref<1x4x8x8xf32, #tpu.memory_space<vmem>>, vector<1x4x8x8xf32>,
    %13 = vector.extract_strided_slice %6 {offsets = [0, 64], sizes = [8, 32], strides = [1, 1]} : vector<8x96xf32> to vector<8x32xf32>
    %14 = vector.shape_cast %13 : vector<8x32xf32> to vector<8x4x8xf32>
    %15 = tpu.transpose %14, [1, 0, 2] : vector<8x4x8xf32> -> vector<4x8x8xf32>
    %c0_10 = arith.constant 0 : index
    %c0_11 = arith.constant 0 : index
    %c0_12 = arith.constant 0 : index
    %c0_13 = arith.constant 0 : index
    %16 = vector.load %arg7[%c0_10, %c0_11, %c0_12, %c0_13] : memref<1x4x8x8xf32, #tpu.memory_space<vmem>>, vector<1x4x8x8xf32>
    %17 = vector.shape_cast %16 : vector<1x4x8x8xf32> to vector<4x8x8xf32>
    %18 = vector.shape_cast %15 : vector<4x8x8xf32> to vector<1x4x8x8xf32>
    tpu.vector_store %arg7[%c0_10, %c0_11, %c0_12, %c0_13], %18 {strides = array<i32>} : memref<1x4x8x8xf32, #tpu.memory_space<vmem>>, vector<1x4x8x8xf32>,
    %19 = vector.extract_strided_slice %6 {offsets = [0, 32], sizes = [8, 32], strides = [1, 1]} : vector<8x96xf32> to vector<8x32xf32>
    %20 = vector.shape_cast %19 : vector<8x32xf32> to vector<8x4x8xf32>
    %21 = tpu.transpose %20, [1, 0, 2] : vector<8x4x8xf32> -> vector<4x8x8xf32>
    %22 = tpu.transpose %21, [0, 2, 1] : vector<4x8x8xf32> -> vector<4x8x8xf32>
    %c0_14 = arith.constant 0 : index
    %c0_15 = arith.constant 0 : index
    %c0_16 = arith.constant 0 : index
    %c0_17 = arith.constant 0 : index
    %23 = vector.load %arg6[%c0_14, %c0_15, %c0_16, %c0_17] : memref<1x4x8x8xf32, #tpu.memory_space<vmem>>, vector<1x4x8x8xf32>
    %24 = vector.shape_cast %23 : vector<1x4x8x8xf32> to vector<4x8x8xf32>
    %25 = vector.shape_cast %22 : vector<4x8x8xf32> to vector<1x4x8x8xf32>
    tpu.vector_store %arg6[%c0_14, %c0_15, %c0_16, %c0_17], %25 {strides = array<i32>} : memref<1x4x8x8xf32, #tpu.memory_space<vmem>>, vector<1x4x8x8xf32>,
    return
  }
  func.func @transform_0(%arg0: i32, %arg1: i32) -> (i32, i32, i32) {
    %c0_i32 = arith.constant 0 : i32
    %c0_i32_0 = arith.constant 0 : i32
    return %arg0, %arg1, %c0_i32 : i32, i32, i32
  }
  func.func @transform_1(%arg0: i32, %arg1: i32) -> (i32, i32) {
    %c0_i32 = arith.constant 0 : i32
    %c0_i32_0 = arith.constant 0 : i32
    %c0_i32_1 = arith.constant 0 : i32
    return %c0_i32, %c0_i32_0 : i32, i32
  }
  func.func @transform_2(%arg0: i32, %arg1: i32) -> (i32, i32) {
    %c0_i32 = arith.constant 0 : i32
    %c0_i32_0 = arith.constant 0 : i32
    %c0_i32_1 = arith.constant 0 : i32
    return %c0_i32, %c0_i32_0 : i32, i32
  }
  func.func @transform_3(%arg0: i32, %arg1: i32) -> (i32, i32, i32, i32) {
    %c0_i32 = arith.constant 0 : i32
    %c0_i32_0 = arith.constant 0 : i32
    %c0_i32_1 = arith.constant 0 : i32
    return %arg0, %c0_i32, %arg1, %c0_i32_0 : i32, i32, i32, i32
  }
  func.func @transform_4(%arg0: i32, %arg1: i32) -> (i32, i32, i32, i32) {
    %c0_i32 = arith.constant 0 : i32
    %c0_i32_0 = arith.constant 0 : i32
    %c0_i32_1 = arith.constant 0 : i32
    return %arg0, %c0_i32, %c0_i32_0, %arg1 : i32, i32, i32, i32
  }
  func.func @transform_5(%arg0: i32, %arg1: i32) -> (i32, i32, i32, i32) {
    %c0_i32 = arith.constant 0 : i32
    %c0_i32_0 = arith.constant 0 : i32
    %c0_i32_1 = arith.constant 0 : i32
    return %arg0, %c0_i32, %arg1, %c0_i32_0 : i32, i32, i32, i32
  }
}

</mosaic_0001>

<bundles_post_ra>
// kernel: tpu_custom_call.1
= control target key start
LH: loop header
LB: loop body
LE: loop exit
PB: predicated region body
PF: predicated region fallthrough
CT: control target
= control target key end

     0   :  { %s1807_s0 = inlined_call_operand.hbm [shape: f32[2,8,32], index: 0, kind: input, shape index: {}]   ;;  %s1808_s1 = inlined_call_operand.hbm [shape: f32[32,96], index: 1, kind: input, shape index: {}]   ;;  %s1809_s2 = inlined_call_operand.vmem [shape: f32[1,96], index: 2, kind: input, shape index: {}]   ;;  %s1810_s3 = inlined_call_operand.hbm [shape: f32[2,4,8,8], index: 3, kind: output, shape index: {0}]   ;;  %s1811_s4 = inlined_call_operand.hbm [shape: f32[2,4,8,8], index: 4, kind: output, shape index: {1}]   ;;  %s1812_s5 = inlined_call_operand.hbm [shape: f32[2,4,8,8], index: 5, kind: output, shape index: {2}]  }
   0x1   :  { %1814 = sst [smem:[#allocation15_spill]] %s1807_s0 }
   0x2   :  { %1815 = sst [smem:[#allocation16_spill]] %s1808_s1 }
   0x3   :  { %1816 = sst [smem:[#allocation17_spill]] %s1809_s2 }
   0x4   :  { %1817 = sst [smem:[#allocation18_spill]] %s1810_s3 }
   0x5   :  { %11 = vsyncpa [#allocation3], 0 }
   0x6   :  { %13 = vsyncpa [#allocation3 + $0x1], 0 }
   0x7   :  { %14 = vsyncpa [#allocation6], 0 }
   0x8   :  { %15 = vsyncpa [#allocation4], 0 }
   0x9   :  { %17 = vsyncpa [#allocation4 + $0x1], 0 }
   0xa   :  { %18 = vsyncpa [#allocation9], 0 }
   0xb   :  { %20 = vsyncpa [#allocation9 + $0x1], 0  ;;  %s1435_s18 = smov 0   ;;  %s1437_s19 = smov 0  }
   0xc   :  { %s1439_s20 = smov 0   ;;  %s1441_s21 = smov 0  }
   0xd   :  { %s1443_s22 = smov 0   ;;  %s1445_s23 = smov 0  }
   0xe LB: > { %s1466_s24 = sadd.s32 4294967295, %s1391_s23   ;;  %p1063_p0 = scmp.ge.s32.totalorder %s1391_s23, 1  ;;  %s1391_s23 = sphi %s1445_s23, %s26_s23   ;;  %s1387_s22 = sphi %s1443_s22, %s1832_s22   ;;  %s1383_s21 = sphi %s1441_s21, %s1831_s21   ;;  %s1379_s20 = sphi %s1439_s20, %s1830_s20   ;;  %s1375_s19 = sphi %s1437_s19, %s1829_s19   ;;  %s1371_s18 = sphi %s1435_s18, %s1828_s18  }
   0xf   : > { %p61_p1 = scmp.eq.s32.totalorder %s1466_s24, 0  ;;  %p197_p2 = scmp.lt.s32.totalorder %s1391_s23, 3 }
  0x10   : > { %s1818_s1 = sld [smem:[#allocation16_spill]]  ;;  %s1393_s29 = smov [#allocation5]  }
  0x11   : > { %p1474_p3 = pnand %p1063_p0, %p197_p2  ;;  %s210_s30 = sshll.u32 %s1393_s29, 4  ;;  %s211_s30 = int_to_ptr.vmem [resolvable:$true] %s210_s30 }
  0x12   : > { %p1065_p6 = scmp.ge.s32.totalorder %s1391_s23, 2  ;;  %s1394_s6 = smov 128  }
  0x13   : > { %p1101_p4 = pneg %p1474_p3  ;;  %s1395_s7 = smov 8  }
  0x14   : > { %s1813_s8 = sadd.s32 4294967294, %s1391_s23   ;;  %s38_s9 = sadd.s32 1, %s1387_s22 }
  0x15   : > { %p1102_p5 = pnand %p1101_p4, %p61_p1  ;;  %s47_s10 = sadd.s32 1, %s1379_s20 }
  0x16   : > { %s208_s27 = sshll.u32 %s1818_s1, 4  ;;  %p40_p7 = scmp.ge.s32.totalorder %s38_s9, 2  ;;  %s209_s27 = int_to_ptr.hbm [resolvable:$true] %s208_s27 }
  0x17   : > { %1104 = dma.hbm_to_vmem [thread:$0]  (!%p1102_p5), %s209_s27, 512, %s211_s30, [#allocation6], %s1394_s6, %s1394_s6, %s1395_s7  }
  0x18   : > { %p54_p8 = scmp.ne.s32.totalorder %s1379_s20, %s1375_s19  ;;  %p55_p9 = scmp.eq.s32.totalorder %s1391_s23, 0 }
  0x19   : > { %p60_p10 = scmp.ne.s32.totalorder %s1375_s19, %s1371_s18  ;;  %s1834_s9 = smov (%p40_p7, %s38_s9), 0 }
  0x1a   : > { %p1493_p11 = por %p55_p9, %p54_p8  ;;  %s42_s13 = ssub.s32 %s1387_s22, %s1834_s9 }
  0x1b   : > { %p1499_p12 = por %p61_p1, %p60_p10  ;;  %p128_p13 = scmp.eq.s32.totalorder %s1466_s24, 1 }
  0x1c   : > { %p45_p0 = scmp.eq.s32.totalorder %s42_s13, 0  ;;  %p134_p2 = scmp.eq.s32.totalorder %s1813_s8, 1 }
  0x1d   : > { %p1508_p4 = por %p128_p13, %p54_p8  ;;  %p1120_p5 = scmp.lt.s32.totalorder %s1391_s23, 2 }
  0x1e   : > { %s1514_s15 = scalar_select %p45_p0, %s1379_s20, %s47_s10  }
  0x1f   : > { %p1516_p7 = por %p134_p2, %p60_p10  ;;  %s227_s17 = sand.u32 1, %s1379_s20  }
  0x20   : > { %s1066_s25 = sshll.u32 %s227_s17, 3  ;;  %s1067_s26 = sshll.u32 %s1387_s22, 3 }
  0x21   : > { %s1824_s0 = sld [smem:[#allocation15_spill]]  ;;  %s231_s6 = scalar_lea.vmem [#allocation2], %s1066_s25 }
  0x22   : > { %s240_s7 = sshll.u32 %s231_s6, 4  ;;  %p1106_p8 = pnand %p1120_p5, %p1493_p11  ;;  %s241_s7 = int_to_ptr.vmem [resolvable:$true] %s240_s7 }
  0x23   : > { %s228_s10 = scalar_lea.sflag [#allocation3], %s227_s17  ;;  %s1530_s8 = sand.u32 (!%p1474_p3), 1, %s1375_s19  }
  0x24   : > { %s1069_s27 = sshll.u32 (!%p1474_p3), %s1530_s8, 3 }
  0x25   : > { %249 = sbr.rel (%p1474_p3) target bundleno = 621 (0x26d), region = 32  ;;  %s255_s25 = scalar_lea.vmem (!%p1474_p3), [#allocation2], %s1069_s27 }
  0x27   : > { %s236_s30 = scalar_lea.hbm %s1824_s0, %s1067_s26  ;;  %s252_s26 = scalar_lea.sflag (!%p1474_p3), [#allocation3], %s1530_s8 }
  0x28   : > { %s238_s13 = sshll.u32 %s236_s30, 4  ;;  %s239_s13 = int_to_ptr.hbm [resolvable:$true] %s238_s13 }
  0x29   : > { %1108 = dma.hbm_to_vmem [thread:$0]  (!%p1106_p8), %s239_s13, 128, %s241_s7, %s228_s10  }
  0x2a   : > { %1354 = dma.done.wait (%p1499_p12), %s252_s26, 128  }
  0x2b   : > { %1356 = vsyncadd (%p1499_p12), %s252_s26, 4294967168 }
  0x2c   : > { %1358 = dma.done.wait (%p61_p1), [#allocation6], 512  }
  0x2d   : > { %1360 = vsyncadd (%p61_p1), [#allocation6], 4294966784  ;;  %v302_v0 = vld [vmem:[#allocation5 + $0x18] sm:$0xff]  ;;  %v301_v1 = vld [vmem:[#allocation5 + $0x10] sm:$0xff]  ;;  %vm307_vm0 = vcmask 261120   ;;  %s1825_s2 = sld [smem:[#allocation17_spill]] }
  0x2e   : > { %323 = vmatpush.msra.mxu0 %v302_v0  ;;  %v300_v2 = vld [vmem:[#allocation5 + $0x8] sm:$0xff]  ;;  %v299_v3 = vld [vmem:[#allocation5] sm:$0xff]  ;;  %v298_v4 = vld [vmem:[%s255_s25] sm:$0xff]  ;;  %s1396_s12 = smov 104   ;;  %s1397_s17 = smov 112   ;;  %vm342_vm1 = vcmask 1047556  }
  0x2f   : > { %s1398_s29 = smov 96   ;;  %s1399_s30 = smov 120   ;;  %v1401_v9 = vmov 1983009808   ;;  %v1402_v17 = vmov 1934713408  }
  0x30   : > { %324 = vmatpush.msra.mxu0 %v301_v1  ;;  %s1400_s6 = smov 64   ;;  %v347_v10 = vunpack.c.l.s4 %v1401_v9  ;;  %v371_v18 = vunpack.c.l.s4 %v1402_v17  ;;  %s1587_s7 = sshll.u32 %s1530_s8, 5  ;;  %vm452_vm2 = vcmask 64512  }
  0x31   : > { %s1598_s13 = scalar_lea.vmem [#allocation7], %s1587_s7  ;;  %s1687_s10 = scalar_lea.vmem [#allocation10], %s1587_s7 }
  0x32   : > { %325 = vmatpush.msra.mxu0 %v300_v2  ;;  %v1551_v15 = vunpack.c.0.s8 %v347_v10  ;;  %v1556_v23 = vunpack.c.0.s8 %v371_v18  ;;  %s861_s27 = sshll.u32 %s1598_s13, 4  ;;  %s1704_s26 = sshll.u32 %s1383_s21, 5  ;;  %s862_s27 = int_to_ptr.vmem [resolvable:$true] %s861_s27 }
  0x33   : > { %v1184_v5 = vld [vmem:[%s1825_s2] ss:$0 sm:$0xff]  ;;  %s1826_s3 = sld [smem:[#allocation18_spill]] }
  0x34   : > { %326 = vmatpush.msra.mxu0 %v299_v3 }
  0x35   : > { %1074 = vmatmul.msk.f32.vlgmr.msra.gmra.mxu0 %vm307_vm0, %v298_v4 }
  0x39   : > { %s860_s11 = scalar_lea.hbm %s1826_s3, %s1704_s26  ;;  %s1265_s21 = scalar_lea.hbm %s1826_s3, 64 }
  0xb2   : > { %v328_v6 = vpop.f32.mrf.mxu0 }
  0xb3   : > { %v329_v7 = vadd.f32 %v1184_v5, %v328_v6 }
  0xb5   : > { %338 = vrot.lane.b32.xlu1 %v329_v7, %s1396_s12  ;;  %335 = vrot.lane.b32.xlu0 %v329_v7, %s1397_s17  ;;  %v344_v14 = vrot.slane %v329_v7, 4  ;;  %s863_s12 = sshll.u32 %s860_s11, 4  ;;  %s838_s17 = scalar_lea.sflag [#allocation4], %s1530_s8  ;;  %s864_s12 = int_to_ptr.hbm [resolvable:$true] %s863_s12 }
  0xbd   : > { %583 = vrot.lane.b32.xlu1 %v329_v7, %s1398_s29  ;;  %332 = vrot.lane.b32.xlu0 %v329_v7, %s1399_s30 }
  0xc5   : > { %457 = vrot.lane.b32.xlu1 %v329_v7, %s1400_s6 }
 0x127   : > { %v339_v8 = vpop.permute.xlu1 %338  ;;  %v336_v11 = vpop.permute.xlu0 %335 }
 0x128   : > { %v341_v12 = vrot.slane %v336_v11, 4  ;;  %463 = vrot.lane.b32.xlu1 %v339_v8, %s1400_s6  ;;  %589 = vrot.lane.b32.xlu0 %v339_v8, %s1398_s29  ;;  %v345_v16 = vsel %vm342_vm1, %v336_v11, %v344_v14  ;;  %v354_v20 = vrot.slane %v339_v8, 4 }
 0x129   : > { %587 = vrot.lane.b32.xlu2 %v336_v11, %s1398_s29  ;;  %v353_v21 = vperm.slane %v345_v16, %v1551_v15 }
 0x12a   : > { %v343_v13 = vsel %vm342_vm1, %v341_v12, %v329_v7 }
 0x12b   : > { %v349_v19 = vperm.slane %v343_v13, %v1551_v15  ;;  %v380_v29 = vrot.slane %v353_v21, 4 }
 0x12d   : > { %v368_v26 = vrot.slane %v349_v19, 4 }
 0x12f   : > { %v333_v22 = vpop.permute.xlu0 %332  ;;  %v584_v17 = vpop.permute.xlu1 %583 }
 0x130   : > { %v355_v24 = vsel %vm342_vm1, %v354_v20, %v333_v22  ;;  %v356_v25 = vrot.slane %v333_v22, 4  ;;  %459 = vrot.lane.b32.xlu0 %v333_v22, %s1400_s6  ;;  %v597_v20 = vrot.slane %v584_v17, 4 }
 0x131   : > { %v361_v27 = vperm.slane %v355_v24, %v1551_v15  ;;  %585 = vrot.lane.b32.xlu2 %v333_v22, %s1398_s29  ;;  %s1259_s29 = sshra.s32 %s864_s12, 4  ;;  %s1260_s29 = int_to_ptr.hbm [resolvable:$true] %s1259_s29 }
 0x132   : > { %v357_v28 = vsel %vm342_vm1, %v339_v8, %v356_v25  ;;  %s1261_s30 = scalar_lea.hbm %s1260_s29, 32  ;;  %p1266_p10 = scmp.lt.s32.totalorder %s1260_s29, %s1826_s3 }
 0x133   : > { %v365_v30 = vperm.slane %v357_v28, %v1551_v15  ;;  %v366_v31 = vrot.slane %v361_v27, 4  ;;  %v369_v32 = vsel %vm342_vm1, %v361_v27, %v368_v26  ;;  %p1262_p1 = scmp.ne.s32.totalorder %s1260_s29, %s1261_s30  ;;  %p1267_p11 = scmp.lt.s32.totalorder %s1265_s21, %s1261_s30 }
 0x134   : > { %v377_v33 = vperm.slane %v369_v32, %v1556_v23 }
 0x135   : > { %v367_v34 = vsel %vm342_vm1, %v366_v31, %v349_v19  ;;  %v378_v35 = vrot.slane %v365_v30, 4  ;;  %v381_v36 = vsel %vm342_vm1, %v365_v30, %v380_v29  ;;  %p1263_p3 = pnand %p1262_p1, %p1508_p4  ;;  %p1268_p12 = por %p1267_p11, %p1266_p10 }
 0x136   : > { %v373_v37 = vperm.slane %v367_v34, %v1556_v23  ;;  %v389_v38 = vperm.slane %v381_v36, %v1556_v23  ;;  %v392_v39 = vrot.slane %v377_v33, 4 }
 0x137   : > { %v379_v40 = vsel %vm342_vm1, %v378_v35, %v353_v21  ;;  %v458_v22 = vpop.permute.xlu1 %457  ;;  %p1264_p9 = pneg %p1263_p3 }
 0x138   : > { %v385_v41 = vperm.slane %v379_v40, %v1556_v23  ;;  %v390_v42 = vrot.slane %v373_v37, 4  ;;  %v393_v43 = vsel %vm342_vm1, 0.0, %v392_v39  ;;  %v396_v44 = vrot.slane %v389_v38, 4 }
 0x139   : > { %v398_v45 = vsel %vm342_vm1, %v392_v39, %v373_v37  ;;  %v403_v46 = vrot.slane %v393_v43, 4  ;;  %461 = vrot.lane.b32.xlu2 %v336_v11, %s1400_s6  ;;  %v471_v27 = vrot.slane %v458_v22, 4  ;;  %p1269_p13 = pnand %p1268_p12, %p1264_p9 }
 0x13a   : > { %v391_v47 = vsel %vm342_vm1, 0.0, %v390_v42  ;;  %v394_v48 = vrot.slane %v385_v41, 4  ;;  %v397_v49 = vsel %vm342_vm1, 0.0, %v396_v44  ;;  %v402_v50 = vperm.slane %v398_v45, %v1551_v15 }
 0x13b   : > { %v404_v51 = vsel %vm342_vm1, %v403_v46, %v391_v47  ;;  %v409_v52 = vsel %vm342_vm1, %v396_v44, %v385_v41  ;;  %v414_v53 = vrot.slane %v397_v49, 4 }
 0x13c   : > { %v395_v54 = vsel %vm342_vm1, 0.0, %v394_v48  ;;  %v408_v55 = vperm.slane %v404_v51, %v1551_v15  ;;  %v413_v56 = vperm.slane %v409_v52, %v1551_v15  ;;  %v422_v57 = vrot.slane %v402_v50, 4 }
 0x13d   : > { %v415_v58 = vsel %vm342_vm1, %v414_v53, %v395_v54 }
 0x13e   : > { %v419_v59 = vperm.slane %v415_v58, %v1551_v15  ;;  %v420_v60 = vrot.slane %v408_v55, 4  ;;  %v423_v61 = vsel %vm342_vm1, %v408_v55, %v422_v57  ;;  %v434_v62 = vrot.slane %v413_v56, 4 }
 0x13f   : > { %v431_v63 = vperm.slane %v423_v61, %v1556_v23 }
 0x140   : > { %v421_v0 = vsel %vm342_vm1, %v420_v60, %v402_v50  ;;  %v432_v1 = vrot.slane %v419_v59, 4  ;;  %v435_v2 = vsel %vm342_vm1, %v419_v59, %v434_v62 }
 0x141   : > { %v427_v3 = vperm.slane %v421_v0, %v1556_v23  ;;  %v450_v4 = vrot.slane %v431_v63, 4  ;;  %v443_v5 = vperm.slane %v435_v2, %v1556_v23 }
 0x142   : > { %v433_v6 = vsel %vm342_vm1, %v432_v1, %v413_v56 }
 0x143   : > { %v439_v7 = vperm.slane %v433_v6, %v1556_v23  ;;  %v446_v8 = vrot.slane %v427_v3, 4  ;;  %v448_v9 = vrot.slane %v443_v5, 4  ;;  %v451_v10 = vsel %vm342_vm1, %v443_v5, %v450_v4 }
 0x144   : > { %456 = vst.msk [vmem:[%s1598_s13 + $0x18] sm:$0xff] %vm452_vm2, %v451_v10 }
 0x145   : > { %v444_v11 = vrot.slane %v439_v7, 4  ;;  %v447_v12 = vsel %vm342_vm1, %v439_v7, %v446_v8  ;;  %v449_v13 = vsel %vm342_vm1, %v448_v9, %v431_v63 }
 0x146   : > { %454 = vst.msk [vmem:[%s1598_s13 + $0x8] sm:$0xff] %vm452_vm2, %v447_v12 }
 0x147   : > { %v445_v14 = vsel %vm342_vm1, %v444_v11, %v427_v3  ;;  %455 = vst.msk [vmem:[%s1598_s13 + $0x10] sm:$0xff] %vm452_vm2, %v449_v13 }
 0x148   : > { %453 = vst.msk [vmem:[%s1598_s13] sm:$0xff] %vm452_vm2, %v445_v14 }
 0x183   : > { %v588_v16 = vpop.permute.xlu2 %587 }
 0x184   : > { %v595_v19 = vrot.slane %v588_v16, 4  ;;  %v598_v24 = vsel %vm342_vm1, %v588_v16, %v597_v20 }
 0x185   : > { %v606_v28 = vperm.slane %v598_v24, %v1551_v15 }
 0x186   : > { %v596_v25 = vsel %vm342_vm1, %v595_v19, %v584_v17 }
 0x187   : > { %v602_v29 = vperm.slane %v596_v25, %v1551_v15  ;;  %v633_v36 = vrot.slane %v606_v28, 4 }
 0x189   : > { %v621_v38 = vrot.slane %v602_v29, 4 }
 0x18b   : > { %v586_v18 = vpop.permute.xlu2 %585 }
 0x18c   : > { %v609_v30 = vrot.slane %v586_v18, 4 }
 0x193   : > { %v462_v21 = vpop.permute.xlu2 %461 }
 0x194   : > { %v469_v26 = vrot.slane %v462_v21, 4  ;;  %v472_v31 = vsel %vm342_vm1, %v462_v21, %v471_v27 }
 0x195   : > { %v480_v39 = vperm.slane %v472_v31, %v1551_v15 }
 0x196   : > { %v470_v33 = vsel %vm342_vm1, %v469_v26, %v458_v22 }
 0x197   : > { %v476_v41 = vperm.slane %v470_v33, %v1551_v15  ;;  %v507_v54 = vrot.slane %v480_v39, 4 }
 0x199   : > { %v495_v53 = vrot.slane %v476_v41, 4 }
 0x19a   : > { %v590_v32 = vpop.permute.xlu0 %589  ;;  %v464_v45 = vpop.permute.xlu1 %463 }
 0x19b   : > { %v607_v34 = vrot.slane %v590_v32, 4  ;;  %v610_v35 = vsel %vm342_vm1, %v590_v32, %v609_v30  ;;  %v481_v55 = vrot.slane %v464_v45, 4 }
 0x19c   : > { %v618_v37 = vperm.slane %v610_v35, %v1551_v15 }
 0x19d   : > { %v608_v40 = vsel %vm342_vm1, %v607_v34, %v586_v18 }
 0x19e   : > { %v614_v42 = vperm.slane %v608_v40, %v1551_v15  ;;  %v631_v43 = vrot.slane %v618_v37, 4  ;;  %v634_v44 = vsel %vm342_vm1, %v618_v37, %v633_v36 }
 0x19f   : > { %v642_v46 = vperm.slane %v634_v44, %v1556_v23 }
 0x1a0   : > { %v619_v47 = vrot.slane %v614_v42, 4  ;;  %v622_v48 = vsel %vm342_vm1, %v614_v42, %v621_v38  ;;  %v632_v49 = vsel %vm342_vm1, %v631_v43, %v606_v28 }
 0x1a1   : > { %v630_v50 = vperm.slane %v622_v48, %v1556_v23  ;;  %v638_v51 = vperm.slane %v632_v49, %v1556_v23  ;;  %v649_v52 = vrot.slane %v642_v46, 4 }
 0x1a2   : > { %v620_v56 = vsel %vm342_vm1, %v619_v47, %v602_v29  ;;  %v460_v57 = vpop.permute.xlu0 %459 }
 0x1a3   : > { %v626_v58 = vperm.slane %v620_v56, %v1556_v23  ;;  %v645_v59 = vrot.slane %v630_v50, 4  ;;  %v647_v60 = vrot.slane %v638_v51, 4  ;;  %v650_v61 = vsel %vm342_vm1, 0.0, %v649_v52 }
 0x1a4   : > { %v662_v62 = vsel %vm342_vm1, %v649_v52, %v638_v51  ;;  %v667_v63 = vrot.slane %v650_v61, 4  ;;  %v482_v0 = vsel %vm342_vm1, %v481_v55, %v460_v57  ;;  %v483_v1 = vrot.slane %v460_v57, 4 }
 0x1a5   : > { %v646_v2 = vsel %vm342_vm1, 0.0, %v645_v59  ;;  %v648_v3 = vsel %vm342_vm1, 0.0, %v647_v60  ;;  %v666_v4 = vperm.slane %v662_v62, %v1551_v15  ;;  %v488_v5 = vperm.slane %v482_v0, %v1551_v15 }
 0x1a6   : > { %v656_v6 = vrot.slane %v646_v2, 4  ;;  %v484_v7 = vsel %vm342_vm1, %v464_v45, %v483_v1  ;;  %v643_v8 = vrot.slane %v626_v58, 4  ;;  %v651_v9 = vsel %vm342_vm1, %v645_v59, %v626_v58 }
 0x1a7   : > { %v492_v10 = vperm.slane %v484_v7, %v1551_v15  ;;  %v493_v11 = vrot.slane %v488_v5, 4  ;;  %v496_v12 = vsel %vm342_vm1, %v488_v5, %v495_v53  ;;  %v655_v13 = vperm.slane %v651_v9, %v1551_v15 }
 0x1a8   : > { %v504_v14 = vperm.slane %v496_v12, %v1556_v23  ;;  %v644_v16 = vsel %vm342_vm1, 0.0, %v643_v8  ;;  %v668_v17 = vsel %vm342_vm1, %v667_v63, %v648_v3  ;;  %v687_v18 = vrot.slane %v666_v4, 4 }
 0x1a9   : > { %v494_v19 = vsel %vm342_vm1, %v493_v11, %v476_v41  ;;  %v505_v20 = vrot.slane %v492_v10, 4  ;;  %v508_v21 = vsel %vm342_vm1, %v492_v10, %v507_v54  ;;  %v657_v22 = vsel %vm342_vm1, %v656_v6, %v644_v16 }
 0x1aa   : > { %v500_v24 = vperm.slane %v494_v19, %v1556_v23  ;;  %v516_v25 = vperm.slane %v508_v21, %v1556_v23  ;;  %v519_v26 = vrot.slane %v504_v14, 4  ;;  %v661_v27 = vperm.slane %v657_v22, %v1551_v15 }
 0x1ab   : > { %v506_v28 = vsel %vm342_vm1, %v505_v20, %v480_v39  ;;  %v672_v29 = vperm.slane %v668_v17, %v1551_v15  ;;  %v675_v30 = vrot.slane %v655_v13, 4 }
 0x1ac   : > { %v512_v31 = vperm.slane %v506_v28, %v1556_v23  ;;  %v517_v32 = vrot.slane %v500_v24, 4  ;;  %v520_v33 = vsel %vm342_vm1, 0.0, %v519_v26  ;;  %v523_v34 = vrot.slane %v516_v25, 4 }
 0x1ad   : > { %v525_v35 = vsel %vm342_vm1, %v519_v26, %v500_v24  ;;  %v530_v36 = vrot.slane %v520_v33, 4  ;;  %v676_v37 = vsel %vm342_vm1, %v661_v27, %v675_v30  ;;  %v688_v38 = vsel %vm342_vm1, %v672_v29, %v687_v18 }
 0x1ae   : > { %v518_v40 = vsel %vm342_vm1, 0.0, %v517_v32  ;;  %v521_v41 = vrot.slane %v512_v31, 4  ;;  %v524_v39 = vsel %vm342_vm1, 0.0, %v523_v34  ;;  %v529_v42 = vperm.slane %v525_v35, %v1551_v15 }
 0x1af   : > { %v531_v43 = vsel %vm342_vm1, %v530_v36, %v518_v40  ;;  %v536_v44 = vsel %vm342_vm1, %v523_v34, %v512_v31  ;;  %v541_v45 = vrot.slane %v524_v39, 4  ;;  %v684_v46 = vperm.slane %v676_v37, %v1556_v23 }
 0x1b0   : > { %v522_v47 = vsel %vm342_vm1, 0.0, %v521_v41  ;;  %v535_v48 = vperm.slane %v531_v43, %v1551_v15  ;;  %v540_v49 = vperm.slane %v536_v44, %v1551_v15  ;;  %v549_v50 = vrot.slane %v529_v42, 4 }
 0x1b1   : > { %v542_v51 = vsel %vm342_vm1, %v541_v45, %v522_v47  ;;  %v696_v52 = vperm.slane %v688_v38, %v1556_v23  ;;  %v673_v53 = vrot.slane %v661_v27, 4  ;;  %v685_v54 = vrot.slane %v672_v29, 4 }
 0x1b2   : > { %v546_v55 = vperm.slane %v542_v51, %v1551_v15  ;;  %v547_v56 = vrot.slane %v535_v48, 4  ;;  %v550_v57 = vsel %vm342_vm1, %v535_v48, %v549_v50  ;;  %v561_v58 = vrot.slane %v540_v49, 4 }
 0x1b3   : > { %v558_v59 = vperm.slane %v550_v57, %v1556_v23  ;;  %v701_v60 = vrot.slane %v696_v52, 4  ;;  %v674_v61 = vsel %vm342_vm1, %v673_v53, %v655_v13  ;;  %v686_v62 = vsel %vm342_vm1, %v685_v54, %v666_v4 }
 0x1b4   : > { %v548_v63 = vsel %vm342_vm1, %v547_v56, %v529_v42  ;;  %v559_v0 = vrot.slane %v546_v55, 4  ;;  %v562_v1 = vsel %vm342_vm1, %v546_v55, %v561_v58  ;;  %v680_v2 = vperm.slane %v674_v61, %v1556_v23 }
 0x1b5   : > { %v554_v15 = vperm.slane %v548_v63, %v1556_v23  ;;  %v570_v3 = vperm.slane %v562_v1, %v1556_v23  ;;  %v577_v5 = vrot.slane %v558_v59, 4  ;;  %v702_v6 = vsel %vm342_vm1, %v701_v60, %v684_v46 }
 0x1b6   : > { %v560_v7 = vsel %vm342_vm1, %v559_v0, %v540_v49  ;;  %769 = vxpose.xlu1.b32.start.end [1/1] (short) (narrow) %v702_v6, 8  ;;  %v692_v4 = vperm.slane %v686_v62, %v1556_v23  ;;  %v699_v8 = vrot.slane %v680_v2, 4  ;;  %v703_v20 = vrot.slane %v684_v46, 4 }
 0x1b7   : > { %v566_v9 = vperm.slane %v560_v7, %v1556_v23  ;;  %v573_v10 = vrot.slane %v554_v15, 4  ;;  %v575_v11 = vrot.slane %v570_v3, 4  ;;  %v578_v12 = vsel %vm342_vm1, %v570_v3, %v577_v5 }
 0x1b8   : > { %v697_v13 = vrot.slane %v692_v4, 4  ;;  %v700_v14 = vsel %vm342_vm1, %v692_v4, %v699_v8  ;;  %582 = vst.msk [vmem:[%s1687_s10 + $0x18] sm:$0xff] %vm452_vm2, %v578_v12  ;;  %v704_v21 = vsel %vm342_vm1, %v696_v52, %v703_v20 }
 0x1b9   : > { %v571_v16 = vrot.slane %v566_v9, 4  ;;  %737 = vxpose.xlu0.b32.start.end [1/1] (short) (narrow) %v700_v14, 8  ;;  %v574_v23 = vsel %vm342_vm1, %v566_v9, %v573_v10  ;;  %v576_v17 = vsel %vm342_vm1, %v575_v11, %v558_v59 }
 0x1ba   : > { %v698_v18 = vsel %vm342_vm1, %v697_v13, %v680_v2  ;;  %580 = vst.msk [vmem:[%s1687_s10 + $0x8] sm:$0xff] %vm452_vm2, %v574_v23 }
 0x1bb   : > { %v572_v19 = vsel %vm342_vm1, %v571_v16, %v554_v15  ;;  %705 = vxpose.xlu2.b32.start.end [1/1] (short) (narrow) %v698_v18, 8  ;;  %581 = vst.msk [vmem:[%s1687_s10 + $0x10] sm:$0xff] %vm452_vm2, %v576_v17 }
 0x1bc   : > { %579 = vst.msk [vmem:[%s1687_s10] sm:$0xff] %vm452_vm2, %v572_v19 }
 0x1c3   : > { %801 = vxpose.xlu2.b32.start.end [1/1] (short) (narrow) %v704_v21, 8 }
 0x1c4   : > { %1272 = shalt.err (!%p1269_p13)
}
 0x1c5   : > { %s1403_s8 = smov 128   ;;  %s1404_s25 = smov 8  }
 0x1c6   : > { %1095 = dma.vmem_to_hbm [thread:$0]  (%p1508_p4), %s862_s27, 512, %s864_s12, %s838_s17, %s1403_s8, %s1403_s8, %s1404_s25  }
 0x1c7   : > { %s290_s0 = scalar_lea.vmem [#allocation8], %s1587_s7  ;;  %s878_s11 = scalar_lea.hbm %s1811_s4, %s1704_s26 }
 0x1c8   : > { %s896_s6 = scalar_lea.hbm %s1812_s5, %s1704_s26  ;;  %s879_s13 = sshll.u32 %s290_s0, 4  ;;  %s880_s13 = int_to_ptr.vmem [resolvable:$true] %s879_s13 }
 0x1c9   : > { %s842_s21 = sand.u32 1, %s1466_s24   ;;  %s1735_s2 = sshll.u32 %s878_s11, 4  ;;  %s882_s2 = int_to_ptr.hbm [resolvable:$true] %s1735_s2 }
 0x1ca   : > { %s897_s3 = sshll.u32 %s1687_s10, 4  ;;  %s1738_s27 = sshll.u32 %s896_s6, 4  ;;  %s1742_s3 = int_to_ptr.vmem [resolvable:$true] %s897_s3  ;;  %s900_s27 = int_to_ptr.hbm [resolvable:$true] %s1738_s27 }
 0x1cb   : > { %s1747_s24 = scalar_lea.sflag [#allocation9], %s842_s21  ;;  %s1287_s7 = sshra.s32 %s882_s2, 4  ;;  %s1288_s7 = int_to_ptr.hbm [resolvable:$true] %s1287_s7 }
 0x1cc   : > { %s1289_s10 = scalar_lea.hbm %s1288_s7, 32  ;;  %s1293_s17 = scalar_lea.hbm %s1811_s4, 64 }
 0x1cd   : > { %p1290_p0 = scmp.ne.s32.totalorder %s1288_s7, %s1289_s10  ;;  %p1294_p8 = scmp.lt.s32.totalorder %s1288_s7, %s1811_s4 }
 0x1ce   : > { %p1295_p1 = scmp.lt.s32.totalorder %s1293_s17, %s1289_s10 }
 0x1cf   : > { %p1291_p2 = pnand %p1290_p0, %p1508_p4 }
 0x1d0   : > { %p1296_p3 = por %p1295_p1, %p1294_p8 }
 0x1d1   : > { %p1292_p5 = pneg %p1291_p2 }
 0x1d3   : > { %p1297_p9 = pnand %p1296_p3, %p1292_p5 }
 0x254   : > { %v721_v22 = vpop.trf.xlu2 }
 0x255   : > { %833 = vst.msk [vmem:[%s290_s0] sm:$0xff] %vm452_vm2, %v721_v22 }
 0x25a   : > { %v785_v24 = vpop.trf.xlu1 }
 0x25b   : > { %835 = vst.msk [vmem:[%s290_s0 + $0x10] sm:$0xff] %vm452_vm2, %v785_v24 }
 0x25c   : > { %v817_v25 = vpop.trf.xlu2 }
 0x25d   : > { %v753_v26 = vpop.trf.xlu0  ;;  %836 = vst.msk [vmem:[%s290_s0 + $0x18] sm:$0xff] %vm452_vm2, %v817_v25 }
 0x25e   : > { %834 = vst.msk [vmem:[%s290_s0 + $0x8] sm:$0xff] %vm452_vm2, %v753_v26 }
 0x25f   : > { %1300 = shalt.err (!%p1297_p9)
}
 0x260   : > { %1096 = dma.vmem_to_hbm [thread:$0]  (%p1508_p4), %s880_s13, 512, %s882_s2, %s1747_s24, %s1403_s8, %s1403_s8, %s1404_s25  }
 0x261   : > { %s1315_s0 = sshra.s32 %s900_s27, 4  ;;  %s1321_s6 = scalar_lea.hbm %s1812_s5, 64  ;;  %s1316_s0 = int_to_ptr.hbm [resolvable:$true] %s1315_s0 }
 0x262   : > { %s1317_s11 = scalar_lea.hbm %s1316_s0, 32  ;;  %p1322_p13 = scmp.lt.s32.totalorder %s1316_s0, %s1812_s5 }
 0x263   : > { %p1318_p10 = scmp.ne.s32.totalorder %s1316_s0, %s1317_s11  ;;  %p1323_p0 = scmp.lt.s32.totalorder %s1321_s6, %s1317_s11 }
 0x265   : > { %p1319_p11 = pnand %p1318_p10, %p1508_p4  ;;  %p1324_p2 = por %p1323_p0, %p1322_p13 }
 0x267   : > { %p1320_p12 = pneg %p1319_p11 }
 0x269   : > { %p1325_p5 = pnand %p1324_p2, %p1320_p12 }
 0x26b   : > { %1328 = shalt.err (!%p1325_p5)
}
 0x26c   : > { %1097 = dma.vmem_to_hbm [thread:$0]  (%p1508_p4), %s1742_s3, 512, %s900_s27, %s1747_s24, %s1403_s8, %s1403_s8, %s1404_s25  }
 0x26d PF: > { %s914_s2 = sand.u32 1, %s1371_s18   ;;  %p1110_p8 = pnand %p1065_p6, %p1516_p7 }
 0x26e   : > { %s915_s13 = scalar_lea.sflag [#allocation4], %s914_s2 }
 0x26f   : > { %p1111_p1 = pneg %p1110_p8 }
 0x271   : > { %1362 = dma.done.wait (%p1111_p1), %s915_s13, 512  }
 0x272   : > { %1364 = vsyncadd (%p1111_p1), %s915_s13, 4294966784  ;;  %s1827_s14 = sadd.s32 4294967294, %s1391_s23  }
 0x273   : > { %s924_s10 = sand.u32 1, %s1827_s14  }
 0x274   : > { %s925_s26 = scalar_lea.sflag [#allocation9], %s924_s10 }
 0x275   : > { %1366 = dma.done.wait (%p1111_p1), %s925_s26, 1024  }
 0x276   : > { %1368 = vsyncadd (%p1111_p1), %s925_s26, 4294966272  ;;  %s26_s23 = sadd.s32 1, %s1391_s23   ;;  %s1828_s18 = smov %s1375_s19 }
 0x277   : > { %p23_p4 = scmp.ge.s32.totalorder %s26_s23, 4   ;;  %s1829_s19 = smov %s1379_s20 }
 0x278   : > { %s1830_s20 = smov %s1514_s15  ;;  %s1831_s21 = smov %s1387_s22 }
 0x279   : > { %s1832_s22 = smov %s1834_s9  ;;  %25 = sbr.rel (!%p23_p4) target bundleno = 14 (0xe), region = 113 }
 0x27e   :  { %941 = vsyncpa [#allocation3], 1 }
 0x27f   :  { %943 = vsyncpa [#allocation3 + $0x1], 1 }
 0x280   :  { %944 = vsyncpa [#allocation6], 1 }
 0x281   :  { %945 = vsyncpa [#allocation4], 1 }
 0x282   :  { %947 = vsyncpa [#allocation4 + $0x1], 1 }
 0x283   :  { %948 = vsyncpa [#allocation9], 1 }
 0x284   :  { %950 = vsyncpa [#allocation9 + $0x1], 1 }

</bundles_post_ra>
